<compile_context>
chip_gen: v5e
topology: v5e:2x2
jax: 0.10.0
libtpu: 0.0.40
codegen_flags: <defaults>
</compile_context>

<pallas_src>
import functools

import jax
import jax.numpy as jnp
from jax.experimental import pallas as pl
from jax.experimental.pallas import tpu as pltpu


def _linear_seq_attn_kernel(x_ref, mask_ref, w_ref, out_ref, acc_ref, *,
                            bt, seq_len, hidden, h_block, mask_h_tail):
    # x_ref:    (bt*seq_len, h_block) VMEM, native input dtype (f32 or bf16)
    # mask_ref: (bt, seq_len)         VMEM, int32 (nonzero == padding)
    # w_ref:    (h_block, 1)          VMEM, x dtype (zero-padded past hidden)
    # out_ref:  (bt, seq_len)         VMEM, f32
    # acc_ref:  (bt, seq_len)         VMEM, f32 score accumulator over H blocks
    h = pl.program_id(1)

    @pl.when(h == 0)
    def _init():
        acc_ref[...] = jnp.zeros_like(acc_ref)

    x = x_ref[...]
    if mask_h_tail:
        # Last H block overruns the true hidden size: zero the garbage columns
        # (weight rows past `hidden` are zero-padded in the wrapper, so valid
        # columns are untouched and 0*0 contributes nothing).
        col = h * h_block + jax.lax.broadcasted_iota(jnp.int32, x.shape, 1)
        x = jnp.where(col < hidden, x, jnp.zeros_like(x))

    # MXU contraction: (bt*L, Ht) @ (Ht, 1) -> (bt*L, 1), f32 accumulate.
    part = jnp.dot(x, w_ref[...], preferred_element_type=jnp.float32)
    acc_ref[...] += part.reshape(bt, seq_len)          # tiny relayout to lane-dense L

    @pl.when(h == pl.num_programs(1) - 1)
    def _finalize():
        # Padding positions -> -inf (matches masked_fill_(-inf)).
        scores = jnp.where(mask_ref[...] != 0, -jnp.inf, acc_ref[...])
        # Numerically-stable softmax over the sequence axis.
        # NOTE: a fully-masked row yields NaN, exactly like the PyTorch module.
        m = jnp.max(scores, axis=-1, keepdims=True)
        e = jnp.exp(scores - m)
        denom = jnp.sum(e, axis=-1, keepdims=True)
        out_ref[...] = (e / denom).astype(out_ref.dtype)   # exact division


def _choose_tiles(B, L, H, itemsize, target_bytes=8 << 20, cap_bytes=16 << 20):
    """Pick (batch rows per block, H columns per block, #H blocks).

    ~8 MiB of x per grid step (hard cap 16 MiB) so double-buffered tiles fit
    comfortably under the 40 MiB vmem limit on every generation. Bt is either a
    multiple of 8 or the full batch (both legal block shapes); if a Bt=8 tile
    would still exceed the cap (huge L*H), the contraction is split along H in
    multiples of 128 and accumulated in-kernel instead of shrinking Bt below 8.
    """
    row_bytes = max(L * H * itemsize, 1)          # one batch row of x
    bt = int(target_bytes // row_bytes)
    if bt >= B or B <= 8:
        bt = B                                    # whole batch per block (full-dim legal)
    else:
        bt = max(8, (bt // 8) * 8)                # sublane-aligned batch tile

    ht = H
    if bt * L * H * itemsize > cap_bytes:         # only then split the contraction
        cols = int(cap_bytes // max(bt * L * itemsize, 1))
        ht = max(128, (cols // 128) * 128)        # lane-aligned H tile
        ht = min(ht, ((H + 127) // 128) * 128)
    num_h = (H + ht - 1) // ht
    return bt, ht, num_h


@functools.partial(jax.jit, static_argnames=("h_block",))
def linear_seq_attn(x, x_mask, weight, bias=None, *, h_block=None):
    """Pallas forward for DrQA LinearSeqAttn.

    Args:
      x:       (B, L, H) activations (f32 or bf16; DMA'd in native dtype).
      x_mask:  (B, L), nonzero == padding.
      weight:  (1, H) nn.Linear(H, 1).weight.
      bias:    (1,)  nn.Linear(H, 1).bias — unused: softmax is shift-invariant,
               so the bias is mathematically a no-op on the output.
      h_block: optional override of the H tile (must be a multiple of 128 or H);
               mainly a test hook for the split-H accumulator path.
    Returns:
      alpha:   (B, L) float32 attention weights (softmax over L).
               Fully-masked rows are NaN, matching the PyTorch module.
    """
    del bias
    B, L, H = x.shape
    itemsize = x.dtype.itemsize

    bt, ht, num_h = _choose_tiles(B, L, H, itemsize)
    if h_block is not None:                       # test hook / manual override
        ht = int(h_block)
        num_h = (H + ht - 1) // ht
    hp = num_h * ht
    mask_h_tail = hp != H

    # Free, contiguous leading-dim merge — no padded HBM copy of x.
    x2 = x.reshape(B * L, H)

    # Mask is H-times smaller than x, so its dtype width is immaterial; use i32.
    mask_i32 = (x_mask != 0).astype(jnp.int32)

    # Weight as an (hp, 1) MXU rhs column in x's dtype; zero-pad the H tail.
    w_col = weight.reshape(H, 1).astype(x.dtype)
    if mask_h_tail:
        w_col = jnp.pad(w_col, ((0, hp - H), (0, 0)))

    rows = bt * L
    grid = (pl.cdiv(B, bt), num_h)

    kernel = functools.partial(
        _linear_seq_attn_kernel,
        bt=bt, seq_len=L, hidden=H, h_block=ht, mask_h_tail=mask_h_tail)

    alpha = pl.pallas_call(
        kernel,
        out_shape=jax.ShapeDtypeStruct((B, L), jnp.float32),
        grid_spec=pltpu.PrefetchScalarGridSpec(
            num_scalar_prefetch=0,
            grid=grid,
            in_specs=[
                # x: bt whole batch rows (bt*L rows of the flattened array).
                # TODO(synk): if xprof shows exposed x DMA on v7x, try
                # pipeline_mode=pl.Buffered(3) here once VMEM headroom allows.
                pl.BlockSpec((rows, ht), lambda r, h: (r, h)),
                pl.BlockSpec((bt, L), lambda r, h: (r, 0)),     # mask
                pl.BlockSpec((ht, 1), lambda r, h: (h, 0)),     # weight column
            ],
            out_specs=pl.BlockSpec((bt, L), lambda r, h: (r, 0)),
            scratch_shapes=[pltpu.VMEM((bt, L), jnp.float32)],  # score accumulator
        ),
        compiler_params=pltpu.CompilerParams(
            # Batch-row axis shards across TensorCores; H axis is a reduction.
            dimension_semantics=("parallel", "arbitrary"),
            vmem_limit_bytes=40 * 1024 * 1024,
        ),
    )(x2, mask_i32, w_col)
    return alpha


def _reference(x, x_mask, weight, bias):
    # Pure-JAX reproduction of the PyTorch forward (bias included).
    scores = jnp.einsum(
        "blh,oh->bl", x.astype(jnp.float32), weight.astype(jnp.float32)
    ) + bias[0]
    scores = jnp.where(x_mask != 0, -jnp.inf, scores)
    return jax.nn.softmax(scores, axis=-1)


if __name__ == "__main__":
    B, L, H = 2, 8, 32
    key = jax.random.PRNGKey(0)
    kx, km, kw, kb = jax.random.split(key, 4)

    x = jax.random.normal(kx, (B, L, H), dtype=jnp.float32)

    # Mask: 1 for padding, 0 for true tokens; keep the first tokens unmasked
    # (a fully-masked row gives NaNs, just like the PyTorch module).
    mask = (jax.random.uniform(km, (B, L)) > 0.7).astype(jnp.float32)
    mask = mask.at[:, :2].set(0.0)

    # Deterministic nn.Linear(H, 1) init (PyTorch-style uniform bounds).
    bound = 1.0 / (H ** 0.5)
    weight = jax.random.uniform(kw, (1, H), minval=-bound, maxval=bound, dtype=jnp.float32)
    bias = jax.random.uniform(kb, (1,), minval=-bound, maxval=bound, dtype=jnp.float32)

    # float32 activations.
    alpha = jax.block_until_ready(linear_seq_attn(x, mask, weight, bias))
    expected = _reference(x, mask, weight, bias)
    assert alpha.shape == (B, L)
    assert jnp.allclose(alpha, expected, atol=1e-4, rtol=1e-4), "f32 mismatch vs reference"
    assert jnp.allclose(jnp.sum(alpha, axis=-1), jnp.ones((B,)), atol=1e-5), "rows must sum to 1"

    # bf16 activations: DMA'd as bf16 and fed straight to the MXU (f32 accumulate).
    x_bf16 = x.astype(jnp.bfloat16)
    w_eff = weight.astype(jnp.bfloat16).astype(jnp.float32)   # kernel casts W to x.dtype
    alpha_bf16 = jax.block_until_ready(linear_seq_attn(x_bf16, mask, weight, bias))
    expected_bf16 = _reference(x_bf16.astype(jnp.float32), mask, w_eff, bias)
    assert jnp.allclose(alpha_bf16, expected_bf16, atol=5e-3, rtol=5e-3), "bf16 mismatch"

    # Split-H accumulator path (H grid axis + pl.when init/finalize), including a
    # ragged H tail (H=200) that exercises the in-kernel column masking.
    zero_bias = jnp.zeros((1,), jnp.float32)
    for H2 in (256, 200):
        kx2, kw2 = jax.random.split(jax.random.PRNGKey(H2), 2)
        x2 = jax.random.normal(kx2, (B, L, H2), dtype=jnp.float32)
        w2 = jax.random.uniform(kw2, (1, H2), minval=-0.1, maxval=0.1, dtype=jnp.float32)
        a2 = jax.block_until_ready(linear_seq_attn(x2, mask, w2, None, h_block=128))
        e2 = _reference(x2, mask, w2, zero_bias)
        assert jnp.allclose(a2, e2, atol=1e-4, rtol=1e-4), f"split-H mismatch (H={H2})"

    print("KERNEL_OK")
</pallas_src>

<mosaic_0001>
module attributes {stable_mosaic.version = 11 : i64} {
  func.func @_linear_seq_attn_kernel(%arg0: i32, %arg1: i32, %arg2: memref<16x32xf32, #tpu.memory_space<vmem>>, %arg3: memref<2x8xi32, #tpu.memory_space<vmem>>, %arg4: memref<32x1xf32, #tpu.memory_space<vmem>>, %arg5: memref<2x8xf32, #tpu.memory_space<vmem>>, %arg6: memref<2x8xf32, #tpu.memory_space<vmem>>) attributes {dimension_semantics = [#tpu.dimension_semantics<parallel>, #tpu.dimension_semantics<arbitrary>], iteration_bounds = array<i64: 1, 1>, scalar_prefetch = 0 : i64, scratch_operands = 1 : i64, tpu.core_type = #tpu.core_type<tc>, window_params = [{transform_indices = @transform_0, window_bounds = array<i64: 16, 32>}, {transform_indices = @transform_1, window_bounds = array<i64: 2, 8>}, {transform_indices = @transform_2, window_bounds = array<i64: 32, 1>}, {transform_indices = @transform_3, window_bounds = array<i64: 2, 8>}]} {
    %c0_i32 = arith.constant 0 : i32
    %0 = arith.cmpi eq, %arg1, %c0_i32 : i32
    %1 = arith.extui %0 : i1 to i32
    %c0_i32_0 = arith.constant 0 : i32
    %2 = arith.cmpi ne, %1, %c0_i32_0 : i32
    scf.if %2 {
      %cst_10 = arith.constant 0.000000e+00 : f32
      %13 = vector.broadcast %cst_10 : f32 to vector<2x8xf32>
      %c0_11 = arith.constant 0 : index
      %c0_12 = arith.constant 0 : index
      %14 = vector.load %arg6[%c0_11, %c0_12] : memref<2x8xf32, #tpu.memory_space<vmem>>, vector<2x8xf32>
      tpu.vector_store %arg6[%c0_11, %c0_12], %13 {strides = array<i32>} : memref<2x8xf32, #tpu.memory_space<vmem>>, vector<2x8xf32>,
    } else {
    }
    %c0 = arith.constant 0 : index
    %c0_1 = arith.constant 0 : index
    %3 = vector.load %arg2[%c0, %c0_1] : memref<16x32xf32, #tpu.memory_space<vmem>>, vector<16x32xf32>
    %c0_2 = arith.constant 0 : index
    %c0_3 = arith.constant 0 : index
    %4 = vector.load %arg4[%c0_2, %c0_3] : memref<32x1xf32, #tpu.memory_space<vmem>>, vector<32x1xf32>
    %cst = arith.constant dense<0.000000e+00> : vector<16x1xf32>
    %5 = tpu.matmul %3, %4, %cst {dimension_numbers = #tpu.dot_dimension_numbers<[1], [0], [0], [1], [0, 0, 1, 1], [], []>} : vector<16x32xf32>, vector<32x1xf32>, vector<16x1xf32> -> vector<16x1xf32>
    %c0_4 = arith.constant 0 : index
    %c0_5 = arith.constant 0 : index
    %6 = vector.load %arg6[%c0_4, %c0_5] : memref<2x8xf32, #tpu.memory_space<vmem>>, vector<2x8xf32>
    %7 = vector.shape_cast %5 : vector<16x1xf32> to vector<2x8xf32>
    %8 = arith.addf %6, %7 : vector<2x8xf32>
    %c0_6 = arith.constant 0 : index
    %c0_7 = arith.constant 0 : index
    %9 = vector.load %arg6[%c0_6, %c0_7] : memref<2x8xf32, #tpu.memory_space<vmem>>, vector<2x8xf32>
    tpu.vector_store %arg6[%c0_6, %c0_7], %8 {strides = array<i32>} : memref<2x8xf32, #tpu.memory_space<vmem>>, vector<2x8xf32>,
    %c0_i32_8 = arith.constant 0 : i32
    %10 = arith.cmpi eq, %arg1, %c0_i32_8 : i32
    %11 = arith.extui %10 : i1 to i32
    %c0_i32_9 = arith.constant 0 : i32
    %12 = arith.cmpi ne, %11, %c0_i32_9 : i32
    scf.if %12 {
      %c0_10 = arith.constant 0 : index
      %c0_11 = arith.constant 0 : index
      %13 = vector.load %arg3[%c0_10, %c0_11] : memref<2x8xi32, #tpu.memory_space<vmem>>, vector<2x8xi32>
      %c0_i32_12 = arith.constant 0 : i32
      %14 = vector.broadcast %c0_i32_12 : i32 to vector<2x8xi32>
      %15 = arith.cmpi ne, %13, %14 : vector<2x8xi32>
      %c0_13 = arith.constant 0 : index
      %c0_14 = arith.constant 0 : index
      %16 = vector.load %arg6[%c0_13, %c0_14] : memref<2x8xf32, #tpu.memory_space<vmem>>, vector<2x8xf32>
      %cst_15 = arith.constant 0xFF800000 : f32
      %17 = vector.broadcast %cst_15 : f32 to vector<2x8xf32>
      %18 = arith.select %15, %17, %16 : vector<2x8xi1>, vector<2x8xf32>
      %cst_16 = arith.constant dense<0xFF800000> : vector<2xf32>
      %19 = vector.multi_reduction <maximumf>, %18, %cst_16 [1] : vector<2x8xf32> to vector<2xf32>
      %20 = vector.shape_cast %19 : vector<2xf32> to vector<2x1xf32>
      %21 = vector.broadcast %20 : vector<2x1xf32> to vector<2x8xf32>
      %22 = arith.subf %18, %21 : vector<2x8xf32>
      %23 = math.exp %22 : vector<2x8xf32>
      %cst_17 = arith.constant dense<0.000000e+00> : vector<2xf32>
      %24 = vector.multi_reduction <add>, %23, %cst_17 [1] : vector<2x8xf32> to vector<2xf32>
      %25 = vector.shape_cast %24 : vector<2xf32> to vector<2x1xf32>
      %26 = vector.broadcast %25 : vector<2x1xf32> to vector<2x8xf32>
      %27 = arith.divf %23, %26 : vector<2x8xf32>
      %c0_18 = arith.constant 0 : index
      %c0_19 = arith.constant 0 : index
      %28 = vector.load %arg5[%c0_18, %c0_19] : memref<2x8xf32, #tpu.memory_space<vmem>>, vector<2x8xf32>
      tpu.vector_store %arg5[%c0_18, %c0_19], %27 {strides = array<i32>} : memref<2x8xf32, #tpu.memory_space<vmem>>, vector<2x8xf32>,
    } else {
    }
    return
  }
  func.func @transform_0(%arg0: i32, %arg1: i32) -> (i32, i32) {
    %c0_i32 = arith.constant 0 : i32
    return %arg0, %arg1 : i32, i32
  }
  func.func @transform_1(%arg0: i32, %arg1: i32) -> (i32, i32) {
    %c0_i32 = arith.constant 0 : i32
    %c0_i32_0 = arith.constant 0 : i32
    return %arg0, %c0_i32 : i32, i32
  }
  func.func @transform_2(%arg0: i32, %arg1: i32) -> (i32, i32) {
    %c0_i32 = arith.constant 0 : i32
    %c0_i32_0 = arith.constant 0 : i32
    return %arg1, %c0_i32 : i32, i32
  }
  func.func @transform_3(%arg0: i32, %arg1: i32) -> (i32, i32) {
    %c0_i32 = arith.constant 0 : i32
    %c0_i32_0 = arith.constant 0 : i32
    return %arg0, %c0_i32 : i32, i32
  }
}

</mosaic_0001>

<bundles_post_ra>
// kernel: linear_seq_attn.1
= control target key start
LH: loop header
LB: loop body
LE: loop exit
PB: predicated region body
PF: predicated region fallthrough
CT: control target
= control target key end

     0   :  { %v164_v3 = vmov 0   ;;  %s216_s0 = inlined_call_operand.vmem [shape: f32[16,32], index: 0, kind: input, shape index: {}]   ;;  %s217_s1 = inlined_call_operand.vmem [shape: s32[2,8], index: 1, kind: input, shape index: {}]   ;;  %s218_s2 = inlined_call_operand.vmem [shape: f32[32,1], index: 2, kind: input, shape index: {}]   ;;  %s219_s3 = inlined_call_operand.hbm [shape: f32[2,8], index: 3, kind: output, shape index: {}]  }
   0x1   :  { %v26_v0 = vld [vmem:[%s218_s2 + $0x18] sm:$0xff]  ;;  %v25_v1 = vld [vmem:[%s218_s2 + $0x10] sm:$0xff]  ;;  %v24_v2 = vld [vmem:[%s218_s2 + $0x8] sm:$0xff]  ;;  %133 = vset.pattern.permute.xlu0 %v164_v3 }
   0x2   :  { %46 = vmatpush.msra.mxu0 %v26_v0  ;;  %126 = vmatpush.msra.mxu1 %v26_v0 }
   0x3   :  { %8 = vsyncpa [#allocation4], 0  ;;  %v23_v4 = vld [vmem:[%s218_s2] sm:$0xff]  ;;  %vm27_vm0 = vcmask 261120   ;;  %v22_v6 = vld [vmem:[%s216_s0 + $0x8] sm:$0xff]  ;;  %vm19_vm1 = vcmask 58368   ;;  %v66_v11 = vlaneseq }
   0x4   :  { %47 = vmatpush.msra.mxu0 %v25_v1  ;;  %127 = vmatpush.msra.mxu1 %v25_v1  ;;  %v21_v5 = vld [vmem:[%s216_s0] sm:$0xff]  ;;  %v165_v9 = vmov 0.0   ;;  %vm70_vm2 = vcmask 1041409   ;;  %s115_s27 = sshll.u32 %s219_s3, 4  ;;  %s116_s27 = int_to_ptr.hbm [resolvable:$true] %s115_s27 }
   0x5   :  { %20 = vst.msk [vmem:[#allocation2] sm:$0x3] %vm19_vm1, %v165_v9  ;;  %v67_v12 = vand.u32 127, %v66_v11  ;;  %v79_v19 = vld [vmem:[%s217_s1] sm:$0x3]  ;;  %s166_s1 = smov [#allocation3]  }
   0x6   :  { %48 = vmatpush.msra.mxu0 %v24_v2  ;;  %128 = vmatpush.msra.mxu1 %v24_v2  ;;  %vm80_vm3 = vcmp.ne.s32.totalorder %v79_v19, 0  ;;  %s113_s24 = sshll.u32 %s166_s1, 4  ;;  %s114_s24 = int_to_ptr.vmem [resolvable:$true] %s113_s24 }
   0x8   :  { %49 = vmatpush.msra.mxu0 %v23_v4  ;;  %129 = vmatpush.msra.mxu1 %v23_v4 }
   0x9   :  { %124 = vmatmul.msk.f32.vlgmr.msra.gmra.mxu0 %vm27_vm0, %v21_v5  ;;  %125 = vmatmul.msk.f32.vlgmr.msra.gmra.mxu1 %vm27_vm0, %v22_v6 }
   0xc   :  { %v57_v15 = vld [vmem:[#allocation2] sm:$0x3] }
  0x86   :  { %v51_v7 = vpop.f32.mrf.mxu0  ;;  %v54_v8 = vpop.f32.mrf.mxu1 }
  0x87   :  { %61 = vperm.xlu0 %133, %v51_v7  }
  0x8f   :  { %64 = vperm.xlu0 %133, %v54_v8  }
  0xf9   :  { %v62_v10 = vpop.permute.xlu0 %61 }
  0xfa   :  { %v68_v14 = vperm.slane %v62_v10, %v67_v12 }
 0x101   :  { %v65_v13 = vpop.permute.xlu0 %64 }
 0x102   :  { %v69_v16 = vperm.slane %v65_v13, %v67_v12 }
 0x104   :  { %v71_v17 = vsel %vm70_vm2, %v69_v16, %v68_v14 }
 0x105   :  { %v73_v18 = vadd.f32 %v71_v17, %v57_v15 }
 0x107   :  { %75 = vst.msk [vmem:[#allocation2] sm:$0x3] %vm19_vm1, %v73_v18 }
 0x10e   :  { %v81_v20 = vld [vmem:[#allocation2] sm:$0x3] }
 0x10f   :  { %v82_v21 = vsel %vm80_vm3, -inf, %v81_v20 }
 0x110   :  { %v83_v22 = vsel %vm19_vm1, %v82_v21, -inf }
 0x111   :  { %84 = vmax.xlane.f32.xlu1 %v83_v22 }
 0x184   :  { %v85_v23 = vpop.xlane.xlu1 %84 }
 0x185   :  { %v86_v24 = vsub.f32 %v82_v21, %v85_v23 }
 0x187   :  { %v87_v25 = vmul.f32 1.442695, %v86_v24 }
 0x189   :  { %134 = vpow2.f32 %v87_v25 }
 0x18f   :  { %v135_v26 = vpop.eup %134 }
 0x190   :  { %v89_v27 = vsel %vm19_vm1, %v135_v26, 0.0 }
 0x191   :  { %90 = vadd.xlane.f32.xlu1 %v89_v27 }
 0x204   :  { %v91_v28 = vpop.xlane.xlu1 %90 }
 0x205   :  { %136 = vrcp.f32 %v91_v28  ;;  %v103_v32 = vand.u32 2147483648, %v91_v28  ;;  %v101_v34 = vand.u32 2147483647, %v91_v28  ;;  %vm97_vm5 = vweird.f32 %v91_v28 }
 0x207   :  { %v104_v36 = vor.u32 1.1754944e-38, %v103_v32  ;;  %vm102_vm7 = vcmp.eq.f32.partialorder %v101_v34, 8.507059e+37 }
 0x20b   :  { %v137_v29 = vpop.eup %136 }
 0x20c   :  { %v93_v30 = vmul.f32 %v137_v29, %v91_v28  ;;  %vm98_vm4 = vweird.f32 %v137_v29 }
 0x20d   :  { %vm99_vm6 = vmor %vm97_vm5, %vm98_vm4 }
 0x20e   :  { %v94_v31 = vsub.f32 1.0, %v93_v30 }
 0x210   :  { %v95_v33 = vmul.f32 %v137_v29, %v94_v31 }
 0x212   :  { %v96_v35 = vadd.f32 %v137_v29, %v95_v33 }
 0x214   :  { %v100_v37 = vsel %vm99_vm6, %v137_v29, %v96_v35 }
 0x215   :  { %v105_v38 = vsel %vm102_vm7, %v104_v36, %v100_v37 }
 0x216   :  { %v106_v39 = vmul.f32 %v135_v26, %v105_v38 }
 0x218   :  { %107 = vst.msk [vmem:[#allocation3] sm:$0x3] %vm19_vm1, %v106_v39 }
 0x219   :  { %118 = dma.vmem_to_hbm [thread:$0]  %s114_s24, 32, %s116_s27, [#allocation4]  }
 0x21a   :  { %162 = dma.done.wait [#allocation4], 32  }
 0x21b   :  { %163 = vsyncadd [#allocation4], 4294967264 }
 0x21c   :  { %123 = vsyncpa [#allocation4], 1 }

</bundles_post_ra>
